<compile_context>
chip_gen: v6e
topology: v6e:2x2x1
jax: 0.10.0
libtpu: 0.0.40
codegen_flags: <defaults>
</compile_context>

<pallas_src>
import functools

import jax
import jax.numpy as jnp
import numpy as np
from jax.experimental import pallas as pl
from jax.experimental.pallas import tpu as pltpu

_LANE = 128


def _ensemble_kernel(x_ref, wrow_ref, sel_ref, b_ref, o_ref, acc_ref,
                     *, lane_chunks, inv_hw):
    """Grid: (row_blocks [parallel], hw_tiles [arbitrary reduction]).

    x_ref:    [ROWS, HW_TILE]  spatial tile t of row block r (ROWS = RB*C)
    wrow_ref: [ROWS, K]        mean-folded head weights, tiled per batch row group
    sel_ref:  [RB, ROWS]       0/1 selector summing the C channel rows per batch
    b_ref:    [1, K]           mean-folded bias
    o_ref:    [RB, K]          ensemble-mean logits for this row block
    acc_ref:  [ROWS, 128] f32  lane-preserving running spatial sum (VMEM scratch)
    """
    t = pl.program_id(1)

    @pl.when(t == 0)
    def _():
        acc_ref[...] = jnp.zeros_like(acc_ref)

    # Lane-preserving accumulation: whole-vreg VPU adds only (no per-tile XLU
    # reduce); the single cross-lane reduce is deferred to the epilogue.
    partial = x_ref[:, 0:_LANE].astype(jnp.float32)
    for j in range(1, lane_chunks):
        partial = partial + x_ref[:, j * _LANE:(j + 1) * _LANE].astype(jnp.float32)
    acc_ref[...] += partial

    @pl.when(t == pl.num_programs(1) - 1)
    def _():
        # One cross-lane reduce per row block, then the mean-folded ensemble
        # head as a single small MXU matmul:
        #   sel @ (pooled * W_rows)  ==  pooled[B, C] @ W_mean[C, K]
        pooled = jnp.sum(acc_ref[...], axis=-1, keepdims=True) * inv_hw  # [ROWS, 1]
        contrib = pooled * wrow_ref[...]                                 # [ROWS, K]
        logits = jnp.dot(sel_ref[...], contrib,
                         preferred_element_type=jnp.float32)            # [RB, K]
        o_ref[...] = (logits + b_ref[...]).astype(o_ref.dtype)


def _round_up(n, m):
    return ((n + m - 1) // m) * m


def _pick_hw_tile(hw_padded, rows, itemsize, max_block_bytes=8 << 20):
    """Largest multiple-of-128 lane tile whose (double-buffered) x block fits budget."""
    max_lanes = max(_LANE, (max_block_bytes // (rows * itemsize)) // _LANE * _LANE)
    return int(min(hw_padded, max_lanes))


def _pick_row_block(B, C, target_rows=256):
    """Batches per row block (parallel grid axis).  Prefer a single block; when
    rows get large, only split into blocks whose sublane count is a multiple of
    8 so all block shapes keep satisfying the (8,128) rule."""
    if B * C <= target_rows:
        return B
    best = B
    for rb in range(8, B, 8):
        if B % rb == 0 and rb * C <= target_rows:
            best = rb
    return best


def model_ensemble_forward(x, weights, biases, *, input_dtype=None):
    """Ensemble-mean forward.

    x:       [B, C, H, W] float32 image batch
    weights: [M, C, K]    per-member GAP-head weights
    biases:  [M, 1, K]    per-member GAP-head biases
    Returns  [B, K]       mean over the M member logits.
    """
    B, C, H, W = x.shape
    M, _, K = weights.shape
    HW = H * W

    # Mean of affine heads is affine: fold the ensemble mean into ONE head.
    w_mean = jnp.mean(weights.astype(jnp.float32), axis=0)            # [C, K]
    b_mean = jnp.mean(biases.astype(jnp.float32), axis=0)             # [1, K]

    rb = _pick_row_block(B, C)
    rows = rb * C
    n_row = B // rb

    x_flat = x.reshape(B * C, HW)                # pure reshape, contiguous
    if input_dtype is not None:
        x_flat = x_flat.astype(input_dtype)      # e.g. bf16 on v6e/v7x (~2x HBM)
    itemsize = jnp.dtype(x_flat.dtype).itemsize

    hw128 = _round_up(HW, _LANE)
    hw_tile = _pick_hw_tile(hw128, rows, itemsize)
    hw_pad = _round_up(hw128, hw_tile)
    n_hw = hw_pad // hw_tile
    if hw_pad != HW:
        # Zero padding is exact: we sum, then multiply by 1/HW_true.
        x_flat = jnp.pad(x_flat, ((0, 0), (0, hw_pad - HW)))

    # Mean-folded head weights tiled per batch-row group, plus a 0/1 selector
    # that sums the C channel rows of each batch on the MXU (keeps the epilogue
    # free of in-kernel sublane<->lane reshapes).
    w_rows = jnp.tile(w_mean, (rb, 1))                                 # [rows, K]
    sel = jnp.repeat(jnp.eye(rb, dtype=jnp.float32), C, axis=1)        # [rb, rows]

    kernel = functools.partial(
        _ensemble_kernel,
        lane_chunks=hw_tile // _LANE,
        inv_hw=1.0 / HW)

    x_block_bytes = rows * hw_tile * itemsize
    small_bytes = int(w_rows.size + sel.size + b_mean.size + B * K) * 4
    vmem_needed = 2 * x_block_bytes + 2 * small_bytes + rows * _LANE * 4
    vmem_limit = int(min(48 << 20, max(32 << 20, 2 * vmem_needed)))

    cost = pl.CostEstimate(
        flops=int(B * C * hw_pad + 2 * B * C * K),
        transcendentals=0,
        bytes_accessed=int(B * C * hw_pad * itemsize) + small_bytes)

    return pl.pallas_call(
        kernel,
        out_shape=jax.ShapeDtypeStruct((B, K), jnp.float32),
        grid_spec=pltpu.PrefetchScalarGridSpec(
            num_scalar_prefetch=0,
            grid=(n_row, n_hw),        # (parallel row blocks, spatial reduction)
            in_specs=[
                pl.BlockSpec((rows, hw_tile), lambda r, t: (r, t)),    # x tile
                pl.BlockSpec((rows, K), lambda r, t: (0, 0)),          # tiled W_mean
                pl.BlockSpec((rb, rows), lambda r, t: (0, 0)),         # row selector
                pl.BlockSpec((1, K), lambda r, t: (0, 0)),             # folded bias
            ],
            out_specs=pl.BlockSpec((rb, K), lambda r, t: (r, 0)),
            scratch_shapes=[pltpu.VMEM((rows, _LANE), jnp.float32)],
        ),
        compiler_params=pltpu.CompilerParams(
            dimension_semantics=("parallel", "arbitrary"),
            vmem_limit_bytes=vmem_limit),
        cost_estimate=cost,
    )(x_flat, w_rows, sel, b_mean)


def _reference(x, weights, biases):
    """Pure-JAX reference mirroring torch: mean(stack([model(x) for model]), 0)."""
    pooled = jnp.mean(x, axis=(2, 3))                                  # [B, C]
    preds = jnp.stack(
        [pooled @ weights[m] + biases[m, 0] for m in range(weights.shape[0])]
    )                                                                  # [M, B, K]
    return jnp.mean(preds, axis=0)                                     # [B, K]


if __name__ == "__main__":
    # Small, deterministic shapes consistent with the module's image-classifier forward.
    B, C, H, W = 2, 4, 16, 16
    M, K = 3, 8  # 3 ensemble members, 8 classes

    key = jax.random.PRNGKey(0)
    kx, kw, kb = jax.random.split(key, 3)
    x = jax.random.normal(kx, (B, C, H, W), dtype=jnp.float32)
    weights = jax.random.normal(kw, (M, C, K), dtype=jnp.float32) * 0.1
    biases = jax.random.normal(kb, (M, 1, K), dtype=jnp.float32) * 0.1

    out = jax.block_until_ready(model_ensemble_forward(x, weights, biases))
    ref = jax.block_until_ready(_reference(x, weights, biases))
    np.testing.assert_allclose(np.asarray(out), np.asarray(ref), rtol=1e-5, atol=1e-5)

    print("KERNEL_OK")
</pallas_src>

<mosaic_0001>
module attributes {stable_mosaic.version = 11 : i64} {
  func.func @_ensemble_kernel(%arg0: i32, %arg1: i32, %arg2: memref<8x256xf32, #tpu.memory_space<vmem>>, %arg3: memref<8x8xf32, #tpu.memory_space<vmem>>, %arg4: memref<2x8xf32, #tpu.memory_space<vmem>>, %arg5: memref<1x8xf32, #tpu.memory_space<vmem>>, %arg6: memref<2x8xf32, #tpu.memory_space<vmem>>, %arg7: memref<8x128xf32, #tpu.memory_space<vmem>>) attributes {dimension_semantics = [#tpu.dimension_semantics<parallel>, #tpu.dimension_semantics<arbitrary>], iteration_bounds = array<i64: 1, 1>, scalar_prefetch = 0 : i64, scratch_operands = 1 : i64, tpu.core_type = #tpu.core_type<tc>, window_params = [{transform_indices = @transform_0, window_bounds = array<i64: 8, 256>}, {pipeline_mode = #tpu.pipeline_mode<synchronous>, transform_indices = @transform_1, window_bounds = array<i64: 8, 8>}, {pipeline_mode = #tpu.pipeline_mode<synchronous>, transform_indices = @transform_2, window_bounds = array<i64: 2, 8>}, {pipeline_mode = #tpu.pipeline_mode<synchronous>, transform_indices = @transform_3, window_bounds = array<i64: 1, 8>}, {transform_indices = @transform_4, window_bounds = array<i64: 2, 8>}]} {
    %c0_i32 = arith.constant 0 : i32
    %0 = arith.cmpi eq, %arg1, %c0_i32 : i32
    %1 = arith.extui %0 : i1 to i32
    %c0_i32_0 = arith.constant 0 : i32
    %2 = arith.cmpi ne, %1, %c0_i32_0 : i32
    scf.if %2 {
      %cst = arith.constant 0.000000e+00 : f32
      %12 = vector.broadcast %cst : f32 to vector<8x128xf32>
      %c0_9 = arith.constant 0 : index
      %c0_10 = arith.constant 0 : index
      %13 = vector.load %arg7[%c0_9, %c0_10] : memref<8x128xf32, #tpu.memory_space<vmem>>, vector<8x128xf32>
      tpu.vector_store %arg7[%c0_9, %c0_10], %12 {strides = array<i32>} : memref<8x128xf32, #tpu.memory_space<vmem>>, vector<8x128xf32>,
    } else {
    }
    %c0 = arith.constant 0 : index
    %c0_1 = arith.constant 0 : index
    %3 = vector.load %arg2[%c0, %c0_1] : memref<8x256xf32, #tpu.memory_space<vmem>>, vector<8x128xf32>
    %c0_2 = arith.constant 0 : index
    %c128 = arith.constant 128 : index
    %4 = vector.load %arg2[%c0_2, %c128] : memref<8x256xf32, #tpu.memory_space<vmem>>, vector<8x128xf32>
    %5 = arith.addf %3, %4 : vector<8x128xf32>
    %c0_3 = arith.constant 0 : index
    %c0_4 = arith.constant 0 : index
    %6 = vector.load %arg7[%c0_3, %c0_4] : memref<8x128xf32, #tpu.memory_space<vmem>>, vector<8x128xf32>
    %7 = arith.addf %6, %5 : vector<8x128xf32>
    %c0_5 = arith.constant 0 : index
    %c0_6 = arith.constant 0 : index
    %8 = vector.load %arg7[%c0_5, %c0_6] : memref<8x128xf32, #tpu.memory_space<vmem>>, vector<8x128xf32>
    tpu.vector_store %arg7[%c0_5, %c0_6], %7 {strides = array<i32>} : memref<8x128xf32, #tpu.memory_space<vmem>>, vector<8x128xf32>,
    %c0_i32_7 = arith.constant 0 : i32
    %9 = arith.cmpi eq, %arg1, %c0_i32_7 : i32
    %10 = arith.extui %9 : i1 to i32
    %c0_i32_8 = arith.constant 0 : i32
    %11 = arith.cmpi ne, %10, %c0_i32_8 : i32
    scf.if %11 {
      %c0_9 = arith.constant 0 : index
      %c0_10 = arith.constant 0 : index
      %12 = vector.load %arg7[%c0_9, %c0_10] : memref<8x128xf32, #tpu.memory_space<vmem>>, vector<8x128xf32>
      %cst = arith.constant dense<0.000000e+00> : vector<8xf32>
      %13 = vector.multi_reduction <add>, %12, %cst [1] : vector<8x128xf32> to vector<8xf32>
      %14 = vector.shape_cast %13 : vector<8xf32> to vector<8x1xf32>
      %cst_11 = arith.constant 3.906250e-03 : f32
      %15 = vector.broadcast %cst_11 : f32 to vector<8x1xf32>
      %16 = arith.mulf %14, %15 : vector<8x1xf32>
      %c0_12 = arith.constant 0 : index
      %c0_13 = arith.constant 0 : index
      %17 = vector.load %arg3[%c0_12, %c0_13] : memref<8x8xf32, #tpu.memory_space<vmem>>, vector<8x8xf32>
      %18 = vector.broadcast %16 : vector<8x1xf32> to vector<8x8xf32>
      %19 = arith.mulf %18, %17 : vector<8x8xf32>
      %c0_14 = arith.constant 0 : index
      %c0_15 = arith.constant 0 : index
      %20 = vector.load %arg4[%c0_14, %c0_15] : memref<2x8xf32, #tpu.memory_space<vmem>>, vector<2x8xf32>
      %cst_16 = arith.constant dense<0.000000e+00> : vector<2x8xf32>
      %21 = tpu.matmul %20, %19, %cst_16 {dimension_numbers = #tpu.dot_dimension_numbers<[1], [0], [0], [1], [0, 0, 1, 1], [], []>} : vector<2x8xf32>, vector<8x8xf32>, vector<2x8xf32> -> vector<2x8xf32>
      %c0_17 = arith.constant 0 : index
      %c0_18 = arith.constant 0 : index
      %22 = vector.load %arg5[%c0_17, %c0_18] : memref<1x8xf32, #tpu.memory_space<vmem>>, vector<1x8xf32>
      %23 = vector.broadcast %22 : vector<1x8xf32> to vector<2x8xf32>
      %24 = arith.addf %21, %23 : vector<2x8xf32>
      %c0_19 = arith.constant 0 : index
      %c0_20 = arith.constant 0 : index
      %25 = vector.load %arg6[%c0_19, %c0_20] : memref<2x8xf32, #tpu.memory_space<vmem>>, vector<2x8xf32>
      tpu.vector_store %arg6[%c0_19, %c0_20], %24 {strides = array<i32>} : memref<2x8xf32, #tpu.memory_space<vmem>>, vector<2x8xf32>,
    } else {
    }
    return
  }
  func.func @transform_0(%arg0: i32, %arg1: i32) -> (i32, i32) {
    %c0_i32 = arith.constant 0 : i32
    return %arg0, %arg1 : i32, i32
  }
  func.func @transform_1(%arg0: i32, %arg1: i32) -> (i32, i32) {
    %c0_i32 = arith.constant 0 : i32
    %c0_i32_0 = arith.constant 0 : i32
    %c0_i32_1 = arith.constant 0 : i32
    return %c0_i32, %c0_i32_0 : i32, i32
  }
  func.func @transform_2(%arg0: i32, %arg1: i32) -> (i32, i32) {
    %c0_i32 = arith.constant 0 : i32
    %c0_i32_0 = arith.constant 0 : i32
    %c0_i32_1 = arith.constant 0 : i32
    return %c0_i32, %c0_i32_0 : i32, i32
  }
  func.func @transform_3(%arg0: i32, %arg1: i32) -> (i32, i32) {
    %c0_i32 = arith.constant 0 : i32
    %c0_i32_0 = arith.constant 0 : i32
    %c0_i32_1 = arith.constant 0 : i32
    return %c0_i32, %c0_i32_0 : i32, i32
  }
  func.func @transform_4(%arg0: i32, %arg1: i32) -> (i32, i32) {
    %c0_i32 = arith.constant 0 : i32
    %c0_i32_0 = arith.constant 0 : i32
    return %arg0, %c0_i32 : i32, i32
  }
}

</mosaic_0001>

<bundles_post_ra>
// kernel: tpu_custom_call.1
= control target key start
LH: loop header
LB: loop body
LE: loop exit
PB: predicated region body
PF: predicated region fallthrough
CT: control target
= control target key end

     0   :  { %9 = vsyncpa [#allocation4], 0  ;;  %s287_s0 = inlined_call_operand.hbm [shape: f32[8,256], index: 0, kind: input, shape index: {}]   ;;  %s288_s1 = inlined_call_operand.hbm [shape: f32[8,8], index: 1, kind: input, shape index: {}]   ;;  %s289_s2 = inlined_call_operand.vmem [shape: f32[2,8], index: 2, kind: input, shape index: {}]   ;;  %s290_s3 = inlined_call_operand.vmem [shape: f32[1,8], index: 3, kind: input, shape index: {}]   ;;  %s291_s4 = inlined_call_operand.hbm [shape: f32[2,8], index: 4, kind: output, shape index: {}]  }
   0x1   :  { %10 = vsyncpa [#allocation7], 0 }
   0x2   :  { %11 = vsyncpa [#allocation5], 0  ;;  %s242_s15 = smov [#allocation3]   ;;  %s243_s17 = smov [#allocation6]  }
   0x3   :  { %s18_s16 = sshll.u32 %s242_s15, 4  ;;  %s28_s18 = sshll.u32 %s243_s17, 4  ;;  %s19_s16 = int_to_ptr.vmem [resolvable:$true] %s18_s16  ;;  %s29_s18 = int_to_ptr.vmem [resolvable:$true] %s28_s18 }
   0x4   :  { %s184_s19 = scalar_lea.vmem %s19_s16, 256  ;;  %p189_p1 = scmp.lt.s32.totalorder %s19_s16, %s19_s16 }
   0x5   :  { %p185_p0 = scmp.ne.s32.totalorder %s19_s16, %s184_s19  ;;  %p190_p2 = scmp.lt.s32.totalorder %s184_s19, %s184_s19 }
   0x7   :  { %p191_p3 = por %p190_p2, %p189_p1 }
   0x9   :  { %p192_p4 = pnand %p191_p3, %p185_p0 }
   0xb   :  { %195 = shalt.err (!%p192_p4)
}
   0xc   :  { %21 = dma.hbm_to_vmem [thread:$0]  %s287_s0, 256, %s19_s16, [#allocation4]  }
   0xd   :  { %s204_s22 = scalar_lea.vmem %s29_s18, 128  ;;  %p209_p6 = scmp.lt.s32.totalorder %s29_s18, %s29_s18 }
   0xe   :  { %p205_p5 = scmp.ne.s32.totalorder %s29_s18, %s204_s22  ;;  %p210_p7 = scmp.lt.s32.totalorder %s204_s22, %s204_s22 }
  0x10   :  { %p211_p8 = por %p210_p7, %p209_p6 }
  0x12   :  { %p212_p9 = pnand %p211_p8, %p205_p5 }
  0x14   :  { %215 = shalt.err (!%p212_p9)
}
  0x15   :  { %31 = dma.hbm_to_vmem [thread:$0]  %s288_s1, 128, %s29_s18, [#allocation7]  }
  0x16   :  { %236 = dma.done.wait [#allocation4], 256  }
  0x17   :  { %237 = vsyncadd [#allocation4], 4294967040 }
  0x18   :  { %238 = dma.done.wait [#allocation7], 128  }
  0x19   :  { %239 = vsyncadd [#allocation7], 4294967168  ;;  %v47_v0 = vld [vmem:[#allocation3] sm:$0xff]  ;;  %v48_v1 = vld [vmem:[#allocation3 + $0x8] sm:$0xff]  ;;  %v244_v3 = vmov 0.0   ;;  %vm245_vm0 = vmmov 0  }
  0x1a   :  { %v49_v2 = vadd.f32 %v48_v1, %v47_v0  ;;  %166 = vmatprep.subr.mxu0 %v244_v3  ;;  %168 = vmatprep.mubr.msk.f32.mxu0 %vm245_vm0, %v244_v3  ;;  %v60_v5 = vld [vmem:[#allocation6] sm:$0xff]  ;;  %v62_v8 = vld [vmem:[%s289_s2] sm:$0x3]  ;;  %vm70_vm1 = vcmask 64512   ;;  %s246_s27 = smov [#allocation8]   ;;  %vm144_vm2 = vcmask 58368  }
  0x1b   :  { %v162_v9 = vld [vmem:[%s290_s3] ss:$0 sm:$0xff]  ;;  %s152_s28 = sshll.u32 %s246_s27, 4  ;;  %s153_s28 = int_to_ptr.vmem [resolvable:$true] %s152_s28 }
  0x1c   :  { %57 = vadd.xlane.f32.xlu0 %v49_v2  ;;  %s216_s29 = scalar_lea.vmem %s153_s28, 32  ;;  %p221_p11 = scmp.lt.s32.totalorder %s153_s28, %s153_s28 }
  0x1d   :  { %p217_p10 = scmp.ne.s32.totalorder %s153_s28, %s216_s29  ;;  %p222_p12 = scmp.lt.s32.totalorder %s216_s29, %s216_s29 }
  0x1f   :  { %p223_p13 = por %p222_p12, %p221_p11 }
  0x21   :  { %p224_p0 = pnand %p223_p13, %p217_p10 }
  0xa5   :  { %v58_v4 = vpop.xlane.xlu0 %57 }
  0xa6   :  { %v59_v6 = vmul.f32 0.00390625, %v58_v4 }
  0xa8   :  { %v61_v7 = vmul.f32 %v60_v5, %v59_v6 }
  0xaa   :  { %167 = vmatpush3.msra.mxu0 %v61_v7 }
  0xab   :  { %169 = vmatmul.mubr.msk.f32.vlgmr.msra.gmra.mxu0 %vm70_vm1, %v62_v8 }
 0x16b   :  { %v140_v10 = vpop.f32.mrf.mxu0 }
 0x16c   :  { %v141_v11 = vadd.f32 %v162_v9, %v140_v10 }
 0x16d   :  { %v170_v12 = vpop.f32.mrf.mxu0 }
 0x16e   :  { %145 = vst.msk [vmem:[#allocation8] sm:$0x3] %vm144_vm2, %v141_v11 }
 0x16f   :  { %227 = shalt.err (!%p224_p0)
}
 0x170   :  { %155 = dma.vmem_to_hbm [thread:$0]  %s153_s28, 32, %s291_s4, [#allocation5]  }
 0x171   :  { %240 = dma.done.wait [#allocation5], 32  }
 0x172   :  { %241 = vsyncadd [#allocation5], 4294967264 }
 0x173   :  { %159 = vsyncpa [#allocation4], 1 }
 0x174   :  { %160 = vsyncpa [#allocation7], 1 }
 0x175   :  { %161 = vsyncpa [#allocation5], 1 }

</bundles_post_ra>
